<compile_context>
chip_gen: v6e
topology: v6e:2x2x1
jax: 0.10.0
libtpu: 0.0.40
codegen_flags: <defaults>
</compile_context>

<pallas_src>
import functools

import jax
import jax.numpy as jnp
from jax.experimental import pallas as pl
from jax.experimental.pallas import tpu as pltpu

IN_DIM = 320
HID_DIM = 50
OUT_DIM = 10

# Lane-dense padded widths (multiples of 128).
HID_PAD = 128
OUT_PAD = 128


def _round_up(x, m):
    return (x + m - 1) // m * m


def net1_clf_kernel(x_ref, w1_ref, b1_ref, w2_ref, b2_ref,
                    logits_ref, e1_ref):
    # fc1: bf16 x / w1 on the MXU, f32 accumulation, f32 bias, ReLU on VPU.
    h = jnp.dot(x_ref[...], w1_ref[...], preferred_element_type=jnp.float32)
    h = h + b1_ref[...]
    e1 = jnp.maximum(h, 0.0)
    e1_ref[...] = e1.astype(e1_ref.dtype)

    # dropout (eval mode) -> identity

    # fc2: cast the f32 activations to bf16 for the MXU, keep f32 accumulator.
    logits = jnp.dot(e1.astype(w2_ref.dtype), w2_ref[...],
                     preferred_element_type=jnp.float32)
    logits = logits + b2_ref[...]
    logits_ref[...] = logits.astype(logits_ref.dtype)


@functools.partial(jax.jit, static_argnames=("batch_tile",))
def net1_clf_forward(x, w1_t, b1, w2_t, b2, *, batch_tile=256):
    """x: [B, 320] f32. Weights pre-transposed: w1_t [320,50], w2_t [50,10].

    Returns (logits [B,10] f32, e1 [B,50] f32).
    """
    B = x.shape[0]
    # Batch tile: multiple of 8 sublanes; cap at `batch_tile` rows so VMEM is
    # bounded by the tile (not by B) and the grid gets >1 step for pipelining.
    TB = batch_tile if B >= batch_tile else _round_up(max(B, 1), 8)
    B_pad = _round_up(B, TB)

    # --- wrapper-side layout plumbing (padding + bf16 casts) ---------------
    x_p = jnp.zeros((B_pad, IN_DIM), jnp.bfloat16).at[:B, :].set(
        x.astype(jnp.bfloat16))
    w1_p = jnp.zeros((IN_DIM, HID_PAD), jnp.bfloat16).at[:, :HID_DIM].set(
        w1_t.astype(jnp.bfloat16))
    b1_p = jnp.zeros((1, HID_PAD), jnp.float32).at[0, :HID_DIM].set(
        b1.astype(jnp.float32))
    w2_p = jnp.zeros((HID_PAD, OUT_PAD), jnp.bfloat16).at[
        :HID_DIM, :OUT_DIM].set(w2_t.astype(jnp.bfloat16))
    b2_p = jnp.zeros((1, OUT_PAD), jnp.float32).at[0, :OUT_DIM].set(
        b2.astype(jnp.float32))

    out_shapes = (
        jax.ShapeDtypeStruct((B_pad, OUT_PAD), jnp.float32),   # logits (padded)
        jax.ShapeDtypeStruct((B_pad, HID_PAD), jnp.float32),   # e1 (padded)
    )

    grid = (B_pad // TB,)
    grid_spec = pltpu.PrefetchScalarGridSpec(
        num_scalar_prefetch=0,
        grid=grid,
        in_specs=[
            # x: tiled along the batch axis.
            pl.BlockSpec((TB, IN_DIM), lambda i: (i, 0)),
            # Weights / biases: constant block index -> loaded once, no re-DMA.
            pl.BlockSpec((IN_DIM, HID_PAD), lambda i: (0, 0)),
            pl.BlockSpec((1, HID_PAD), lambda i: (0, 0)),
            pl.BlockSpec((HID_PAD, OUT_PAD), lambda i: (0, 0)),
            pl.BlockSpec((1, OUT_PAD), lambda i: (0, 0)),
        ],
        out_specs=(
            pl.BlockSpec((TB, OUT_PAD), lambda i: (i, 0)),
            pl.BlockSpec((TB, HID_PAD), lambda i: (i, 0)),
        ),
    )

    flops = 2 * B_pad * (IN_DIM * HID_PAD + HID_PAD * OUT_PAD)
    bytes_accessed = (
        B_pad * IN_DIM * 2                       # x (bf16)
        + IN_DIM * HID_PAD * 2                   # w1 (bf16)
        + HID_PAD * OUT_PAD * 2                  # w2 (bf16)
        + (HID_PAD + OUT_PAD) * 4                # biases (f32)
        + B_pad * (HID_PAD + OUT_PAD) * 4        # outputs (f32)
    )
    cost = pl.CostEstimate(flops=flops, transcendentals=0,
                           bytes_accessed=bytes_accessed)

    logits_p, e1_p = pl.pallas_call(
        net1_clf_kernel,
        out_shape=out_shapes,
        grid_spec=grid_spec,
        cost_estimate=cost,
        compiler_params=pltpu.CompilerParams(
            dimension_semantics=("parallel",),
            vmem_limit_bytes=32 * 1024 * 1024,
        ),
    )(x_p, w1_p, b1_p, w2_p, b2_p)

    logits = logits_p[:B, :OUT_DIM]
    e1 = e1_p[:B, :HID_DIM]
    return logits, e1


def init_params(key):
    """Deterministic synthetic params matching nn.Linear(320,50), nn.Linear(50,10)."""
    k1, k2, k3, k4 = jax.random.split(key, 4)
    # PyTorch nn.Linear default init: U(-1/sqrt(in), 1/sqrt(in))
    lim1 = 1.0 / jnp.sqrt(jnp.float32(IN_DIM))
    lim2 = 1.0 / jnp.sqrt(jnp.float32(HID_DIM))
    w1 = jax.random.uniform(k1, (HID_DIM, IN_DIM), jnp.float32, -lim1, lim1)
    b1 = jax.random.uniform(k2, (HID_DIM,), jnp.float32, -lim1, lim1)
    w2 = jax.random.uniform(k3, (OUT_DIM, HID_DIM), jnp.float32, -lim2, lim2)
    b2 = jax.random.uniform(k4, (OUT_DIM,), jnp.float32, -lim2, lim2)
    return w1, b1, w2, b2


def _reference(x, w1_t, b1, w2_t, b2):
    e1_ref = jnp.maximum(x @ w1_t + b1, 0.0)
    logits_ref = e1_ref @ w2_t + b2
    return logits_ref, e1_ref


if __name__ == "__main__":
    key = jax.random.PRNGKey(0)
    kx1, kx2, kp = jax.random.split(key, 3)

    w1, b1, w2, b2 = init_params(kp)
    # Pre-transpose weights once (glue in plain JAX).
    w1_t = w1.T  # [320, 50]
    w2_t = w2.T  # [50, 10]

    # Small batch (single grid step).
    B1 = 8
    x1 = jax.random.normal(kx1, (B1, IN_DIM), jnp.float32)
    logits1, e1_1 = net1_clf_forward(x1, w1_t, b1, w2_t, b2)
    jax.block_until_ready((logits1, e1_1))
    logits1_ref, e1_1_ref = _reference(x1, w1_t, b1, w2_t, b2)
    assert jnp.allclose(e1_1, e1_1_ref, atol=2e-2, rtol=2e-2)
    assert jnp.allclose(logits1, logits1_ref, atol=2e-2, rtol=2e-2)

    # Larger, non-multiple batch (exercises batch tiling + padding path).
    B2 = 300
    x2 = jax.random.normal(kx2, (B2, IN_DIM), jnp.float32)
    logits2, e1_2 = net1_clf_forward(x2, w1_t, b1, w2_t, b2)
    jax.block_until_ready((logits2, e1_2))
    logits2_ref, e1_2_ref = _reference(x2, w1_t, b1, w2_t, b2)
    assert jnp.allclose(e1_2, e1_2_ref, atol=2e-2, rtol=2e-2)
    assert jnp.allclose(logits2, logits2_ref, atol=2e-2, rtol=2e-2)

    print("KERNEL_OK")
</pallas_src>

<mosaic_0001>
module attributes {stable_mosaic.version = 11 : i64} {
  func.func @net1_clf_kernel(%arg0: i32, %arg1: memref<8x320xbf16, #tpu.memory_space<vmem>>, %arg2: memref<320x128xbf16, #tpu.memory_space<vmem>>, %arg3: memref<1x128xf32, #tpu.memory_space<vmem>>, %arg4: memref<128x128xbf16, #tpu.memory_space<vmem>>, %arg5: memref<1x128xf32, #tpu.memory_space<vmem>>, %arg6: memref<8x128xf32, #tpu.memory_space<vmem>>, %arg7: memref<8x128xf32, #tpu.memory_space<vmem>>) attributes {dimension_semantics = [#tpu.dimension_semantics<parallel>], iteration_bounds = array<i64: 1>, scalar_prefetch = 0 : i64, scratch_operands = 0 : i64, tpu.core_type = #tpu.core_type<tc>, window_params = [{transform_indices = @transform_0, window_bounds = array<i64: 8, 320>}, {pipeline_mode = #tpu.pipeline_mode<synchronous>, transform_indices = @transform_1, window_bounds = array<i64: 320, 128>}, {pipeline_mode = #tpu.pipeline_mode<synchronous>, transform_indices = @transform_2, window_bounds = array<i64: 1, 128>}, {pipeline_mode = #tpu.pipeline_mode<synchronous>, transform_indices = @transform_3, window_bounds = array<i64: 128, 128>}, {pipeline_mode = #tpu.pipeline_mode<synchronous>, transform_indices = @transform_4, window_bounds = array<i64: 1, 128>}, {transform_indices = @transform_5, window_bounds = array<i64: 8, 128>}, {transform_indices = @transform_6, window_bounds = array<i64: 8, 128>}]} {
    %c0 = arith.constant 0 : index
    %c0_0 = arith.constant 0 : index
    %0 = vector.load %arg1[%c0, %c0_0] : memref<8x320xbf16, #tpu.memory_space<vmem>>, vector<8x320xbf16>
    %c0_1 = arith.constant 0 : index
    %c0_2 = arith.constant 0 : index
    %1 = vector.load %arg2[%c0_1, %c0_2] : memref<320x128xbf16, #tpu.memory_space<vmem>>, vector<320x128xbf16>
    %cst = arith.constant dense<0.000000e+00> : vector<8x128xf32>
    %2 = tpu.matmul %0, %1, %cst {dimension_numbers = #tpu.dot_dimension_numbers<[1], [0], [0], [1], [0, 0, 1, 1], [], []>} : vector<8x320xbf16>, vector<320x128xbf16>, vector<8x128xf32> -> vector<8x128xf32>
    %c0_3 = arith.constant 0 : index
    %c0_4 = arith.constant 0 : index
    %3 = vector.load %arg3[%c0_3, %c0_4] : memref<1x128xf32, #tpu.memory_space<vmem>>, vector<1x128xf32>
    %4 = vector.broadcast %3 : vector<1x128xf32> to vector<8x128xf32>
    %5 = arith.addf %2, %4 : vector<8x128xf32>
    %cst_5 = arith.constant 0.000000e+00 : f32
    %6 = vector.broadcast %cst_5 : f32 to vector<8x128xf32>
    %7 = arith.maximumf %5, %6 : vector<8x128xf32>
    %c0_6 = arith.constant 0 : index
    %c0_7 = arith.constant 0 : index
    %8 = vector.load %arg7[%c0_6, %c0_7] : memref<8x128xf32, #tpu.memory_space<vmem>>, vector<8x128xf32>
    tpu.vector_store %arg7[%c0_6, %c0_7], %7 {strides = array<i32>} : memref<8x128xf32, #tpu.memory_space<vmem>>, vector<8x128xf32>,
    %9 = arith.truncf %7 : vector<8x128xf32> to vector<8x128xbf16>
    %c0_8 = arith.constant 0 : index
    %c0_9 = arith.constant 0 : index
    %10 = vector.load %arg4[%c0_8, %c0_9] : memref<128x128xbf16, #tpu.memory_space<vmem>>, vector<128x128xbf16>
    %cst_10 = arith.constant dense<0.000000e+00> : vector<8x128xf32>
    %11 = tpu.matmul %9, %10, %cst_10 {dimension_numbers = #tpu.dot_dimension_numbers<[1], [0], [0], [1], [0, 0, 1, 1], [], []>} : vector<8x128xbf16>, vector<128x128xbf16>, vector<8x128xf32> -> vector<8x128xf32>
    %c0_11 = arith.constant 0 : index
    %c0_12 = arith.constant 0 : index
    %12 = vector.load %arg5[%c0_11, %c0_12] : memref<1x128xf32, #tpu.memory_space<vmem>>, vector<1x128xf32>
    %13 = vector.broadcast %12 : vector<1x128xf32> to vector<8x128xf32>
    %14 = arith.addf %11, %13 : vector<8x128xf32>
    %c0_13 = arith.constant 0 : index
    %c0_14 = arith.constant 0 : index
    %15 = vector.load %arg6[%c0_13, %c0_14] : memref<8x128xf32, #tpu.memory_space<vmem>>, vector<8x128xf32>
    tpu.vector_store %arg6[%c0_13, %c0_14], %14 {strides = array<i32>} : memref<8x128xf32, #tpu.memory_space<vmem>>, vector<8x128xf32>,
    return
  }
  func.func @transform_0(%arg0: i32) -> (i32, i32) {
    %c0_i32 = arith.constant 0 : i32
    %c0_i32_0 = arith.constant 0 : i32
    return %arg0, %c0_i32 : i32, i32
  }
  func.func @transform_1(%arg0: i32) -> (i32, i32) {
    %c0_i32 = arith.constant 0 : i32
    %c0_i32_0 = arith.constant 0 : i32
    %c0_i32_1 = arith.constant 0 : i32
    return %c0_i32, %c0_i32_0 : i32, i32
  }
  func.func @transform_2(%arg0: i32) -> (i32, i32) {
    %c0_i32 = arith.constant 0 : i32
    %c0_i32_0 = arith.constant 0 : i32
    %c0_i32_1 = arith.constant 0 : i32
    return %c0_i32, %c0_i32_0 : i32, i32
  }
  func.func @transform_3(%arg0: i32) -> (i32, i32) {
    %c0_i32 = arith.constant 0 : i32
    %c0_i32_0 = arith.constant 0 : i32
    %c0_i32_1 = arith.constant 0 : i32
    return %c0_i32, %c0_i32_0 : i32, i32
  }
  func.func @transform_4(%arg0: i32) -> (i32, i32) {
    %c0_i32 = arith.constant 0 : i32
    %c0_i32_0 = arith.constant 0 : i32
    %c0_i32_1 = arith.constant 0 : i32
    return %c0_i32, %c0_i32_0 : i32, i32
  }
  func.func @transform_5(%arg0: i32) -> (i32, i32) {
    %c0_i32 = arith.constant 0 : i32
    %c0_i32_0 = arith.constant 0 : i32
    return %arg0, %c0_i32 : i32, i32
  }
  func.func @transform_6(%arg0: i32) -> (i32, i32) {
    %c0_i32 = arith.constant 0 : i32
    %c0_i32_0 = arith.constant 0 : i32
    return %arg0, %c0_i32 : i32, i32
  }
}

</mosaic_0001>

<bundles_post_ra>
// kernel: net1_clf_forward.1
= control target key start
LH: loop header
LB: loop body
LE: loop exit
PB: predicated region body
PF: predicated region fallthrough
CT: control target
= control target key end

     0   :  { %12 = vsyncpa [#allocation3], 0  ;;  %v612_v2 = vmov 0.0   ;;  %vm613_vm0 = vmmov 0   ;;  %vm204_vm1 = vcmask 523264   ;;  %s769_s0 = inlined_call_operand.vmem [shape: bf16[8,320], index: 0, kind: input, shape index: {}]   ;;  %s770_s1 = inlined_call_operand.vmem [shape: bf16[320,128], index: 1, kind: input, shape index: {}]   ;;  %s771_s2 = inlined_call_operand.vmem [shape: f32[1,128], index: 2, kind: input, shape index: {}]   ;;  %s772_s3 = inlined_call_operand.vmem [shape: bf16[128,128], index: 3, kind: input, shape index: {}]   ;;  %s773_s4 = inlined_call_operand.vmem [shape: f32[1,128], index: 4, kind: input, shape index: {}]   ;;  %s774_s5 = inlined_call_operand.hbm [shape: f32[8,128], index: 5, kind: output, shape index: {0}]   ;;  %s775_s6 = inlined_call_operand.hbm [shape: f32[8,128], index: 6, kind: output, shape index: {1}]  }
   0x1   :  { %v537_v0 = vld [vmem:[%s770_s1 + $0x78] sm:$0xff]   ;;  %501 = vmatprep.subr.bf16.mxu1 %v612_v2  ;;  %v539_v3 = vld [vmem:[%s770_s1 + $0x70] sm:$0xff]   ;;  %509 = vmatprep.mubr.msk.bf16.mxu1 %vm613_vm0, %v612_v2  ;;  %v541_v5 = vld [vmem:[%s770_s1 + $0x68] sm:$0xff]  }
   0x2   :  { %v538_v1 = vld [vmem:[%s770_s1 + $0x38] sm:$0xff]   ;;  %465 = vmatprep.subr.bf16.mxu0 %v537_v0  ;;  %v540_v4 = vld [vmem:[%s770_s1 + $0x30] sm:$0xff]   ;;  %v542_v6 = vld [vmem:[%s770_s1 + $0x28] sm:$0xff]  }
   0x3   :  { %466 = vmatpush3.bf16.msra.mxu0 %v538_v1  ;;  %v543_v7 = vld [vmem:[%s770_s1 + $0x60] sm:$0xff]   ;;  %v547_v8 = vld [vmem:[%s770_s1 + $0x98] sm:$0xff]   ;;  %v550_v11 = vld [vmem:[%s770_s1 + $0x90] sm:$0xff]  }
   0x4   :  { %467 = vmatprep.subr.bf16.mxu0 %v539_v3  ;;  %v544_v9 = vld [vmem:[%s770_s1 + $0x20] sm:$0xff]   ;;  %v545_v10 = vld [vmem:[%s770_s1 + $0x58] sm:$0xff]   ;;  %502 = vmatpush3.bf16.msra.mxu1 %v547_v8  ;;  %v548_v13 = vld [vmem:[%s770_s1 + $0x50] sm:$0xff]  }
   0x5   :  { %503 = vmatprep.subr.bf16.mxu1 %v612_v2  ;;  %v546_v12 = vld [vmem:[%s770_s1 + $0x18] sm:$0xff]   ;;  %v553_v14 = vld [vmem:[%s770_s1 + $0x88] sm:$0xff]   ;;  %v549_v15 = vld [vmem:[%s770_s1 + $0x10] sm:$0xff]  }
   0x6   :  { %v551_v16 = vld [vmem:[%s770_s1 + $0x48] sm:$0xff]   ;;  %v556_v17 = vld [vmem:[%s770_s1 + $0x80] sm:$0xff]   ;;  %v560_v23 = vld [vmem:[%s772_s3 + $0x38] sm:$0xff]  }
   0x7   :  { %468 = vmatpush3.bf16.msra.mxu0 %v540_v4  ;;  %v25_v18 = vld [vmem:[%s769_s0] sm:$0xff]  ;;  %v552_v19 = vld [vmem:[%s770_s1 + $0x8] sm:$0xff]   ;;  %v561_v25 = vld [vmem:[%s772_s3 + $0x30] sm:$0xff]  }
   0x8   :  { %469 = vmatprep.subr.bf16.mxu0 %v541_v5  ;;  %504 = vmatpush3.bf16.msra.mxu1 %v550_v11  ;;  %v433_v20 = vcombine.high %v25_v18, %v25_v18  ;;  %v554_v21 = vld [vmem:[%s770_s1 + $0x40] sm:$0xff]   ;;  %v559_v22 = vld [vmem:[%s769_s0 + $0x8] ss:$0 sps:$4 sm:$0xff]  }
   0x9   :  { %505 = vmatprep.subr.bf16.mxu1 %v612_v2  ;;  %v555_v24 = vld [vmem:[%s770_s1] sm:$0xff]  }
   0xa   :  { %240 = vmatprep.mubr.bf16.mxu0 %v433_v20 }
   0xb   :  { %470 = vmatpush3.bf16.msra.mxu0 %v542_v6 }
   0xc   :  { %471 = vmatprep.subr.bf16.mxu0 %v543_v7  ;;  %506 = vmatpush3.bf16.msra.mxu1 %v553_v14 }
   0xd   :  { %507 = vmatprep.subr.bf16.mxu1 %v612_v2 }
   0xf   :  { %472 = vmatpush3.bf16.msra.mxu0 %v544_v9 }
  0x10   :  { %473 = vmatprep.subr.bf16.mxu0 %v545_v10  ;;  %508 = vmatpush3.bf16.msra.mxu1 %v556_v17 }
  0x11   :  { %513 = vmatprep.subr.bf16.mxu1 %v612_v2 }
  0x13   :  { %474 = vmatpush3.bf16.msra.mxu0 %v546_v12  ;;  %510 = vmatmul.mubr.msk.bf16.vlgmr.msra.gmra.mxu1 %vm204_vm1, %v559_v22 }
  0x14   :  { %475 = vmatprep.subr.bf16.mxu0 %v548_v13  ;;  %514 = vmatpush3.bf16.msra.mxu1 %v560_v23 }
  0x17   :  { %476 = vmatpush3.bf16.msra.mxu0 %v549_v15 }
  0x18   :  { %477 = vmatprep.subr.bf16.mxu0 %v551_v16 }
  0x1b   :  { %478 = vmatpush3.bf16.msra.mxu0 %v552_v19 }
  0x1c   :  { %479 = vmatprep.subr.bf16.mxu0 %v554_v21 }
  0x1d   :  { %13 = vsyncpa [#allocation5], 0  ;;  %515 = vmatprep.subr.bf16.mxu1 %v612_v2  ;;  %529 = vmatprep.mubr.msk.bf16.mxu1 %vm613_vm0, %v612_v2  ;;  %v432_v26 = vcombine.low %v25_v18, %v25_v18  ;;  %v562_v27 = vld [vmem:[%s772_s3 + $0x28] sm:$0xff]   ;;  %v563_v28 = vld [vmem:[%s772_s3 + $0x20] sm:$0xff]  }
  0x1e   :  { %516 = vmatpush3.bf16.msra.mxu1 %v561_v25  ;;  %v564_v29 = vld [vmem:[%s772_s3 + $0x18] sm:$0xff]   ;;  %v565_v30 = vld [vmem:[%s772_s3 + $0x10] sm:$0xff]   ;;  %v566_v31 = vld [vmem:[%s772_s3 + $0x8] sm:$0xff]  }
  0x1f   :  { %480 = vmatpush3.bf16.msra.mxu0 %v555_v24  ;;  %517 = vmatprep.subr.bf16.mxu1 %v612_v2  ;;  %v567_v32 = vld [vmem:[%s772_s3] sm:$0xff]   ;;  %s614_s3 = smov [#allocation4]  }
  0x20   :  { %v431_v38 = vld [vmem:[%s771_s2] ss:$0 sm:$0xff]  ;;  %s419_s9 = sshll.u32 %s614_s3, 4  ;;  %s420_s9 = int_to_ptr.vmem [resolvable:$true] %s419_s9 }
  0x21   :  { %s568_s10 = scalar_lea.vmem %s420_s9, 128  ;;  %p573_p1 = scmp.lt.s32.totalorder %s420_s9, %s420_s9 }
  0x22   :  { %241 = vmatmul.mubr.bf16.vlgmr.msra.gmra.mxu0 %v432_v26  ;;  %518 = vmatpush3.bf16.msra.mxu1 %v562_v27  ;;  %p569_p0 = scmp.ne.s32.totalorder %s420_s9, %s568_s10  ;;  %p574_p2 = scmp.lt.s32.totalorder %s568_s10, %s568_s10 }
  0x23   :  { %519 = vmatprep.subr.bf16.mxu1 %v612_v2 }
  0x24   :  { %p575_p3 = por %p574_p2, %p573_p1 }
  0x26   :  { %520 = vmatpush3.bf16.msra.mxu1 %v563_v28  ;;  %p576_p4 = pnand %p575_p3, %p569_p0 }
  0x27   :  { %521 = vmatprep.subr.bf16.mxu1 %v612_v2 }
  0x2a   :  { %522 = vmatpush3.bf16.msra.mxu1 %v564_v29 }
  0x2b   :  { %523 = vmatprep.subr.bf16.mxu1 %v612_v2 }
  0x2e   :  { %524 = vmatpush3.bf16.msra.mxu1 %v565_v30 }
  0x2f   :  { %525 = vmatprep.subr.bf16.mxu1 %v612_v2 }
  0x32   :  { %526 = vmatpush3.bf16.msra.mxu1 %v566_v31 }
  0x33   :  { %527 = vmatprep.subr.bf16.mxu1 %v612_v2 }
  0x36   :  { %528 = vmatpush3.bf16.msra.mxu1 %v567_v32 }
  0xd3   :  { %v282_v33 = vpop.f32.mrf.mxu1 }
  0xd5   :  { %v511_v34 = vpop.f32.mrf.mxu1 }
  0xd7   :  { %v285_v35 = vpop.f32.mrf.mxu1 }
  0xd9   :  { %v512_v36 = vpop.f32.mrf.mxu1 }
  0xe2   :  { %v481_v37 = vpop.f32.mrf.mxu0 }
  0xe4   :  { %v482_v39 = vpop.f32.mrf.mxu0 }
  0xe5   :  { %v483_v40 = vadd.f32 %v482_v39, %v481_v37 }
  0xe6   :  { %v484_v41 = vpop.f32.mrf.mxu0 }
  0xe7   :  { %v243_v42 = vadd.f32 %v483_v40, %v431_v38 }
  0xe8   :  { %v485_v43 = vpop.f32.mrf.mxu0 }
  0xe9   :  { %v283_v44 = vadd.f32 %v282_v33, %v243_v42 }
  0xeb   :  { %v288_v45 = vmax.f32 %v283_v44, 0.0 }
  0xed   :  { %v290_v46 = vpack.c.bf16 %v288_v45, %v288_v45  ;;  %289 = vst [vmem:[#allocation4] sm:$0xff] %v288_v45 }
  0xef   :  { %530 = vmatmul.mubr.bf16.vlgmr.msra.gmra.mxu1 %v290_v46 }
  0xf0   :  { %579 = shalt.err (!%p576_p4)
}
  0xf1   :  { %422 = dma.vmem_to_hbm [thread:$0]  %s420_s9, 128, %s775_s6, [#allocation5]   ;;  %v456_v47 = vld [vmem:[%s773_s4] ss:$0 sm:$0xff] }
  0xf2   :  { %s615_s14 = smov [#allocation2]  }
  0xf3   :  { %s409_s15 = sshll.u32 %s615_s14, 4  ;;  %s410_s15 = int_to_ptr.vmem [resolvable:$true] %s409_s15 }
  0xf4   :  { %s588_s16 = scalar_lea.vmem %s410_s15, 128  ;;  %p593_p6 = scmp.lt.s32.totalorder %s410_s15, %s410_s15 }
  0xf5   :  { %p589_p5 = scmp.ne.s32.totalorder %s410_s15, %s588_s16  ;;  %p594_p7 = scmp.lt.s32.totalorder %s588_s16, %s588_s16 }
  0xf7   :  { %p595_p8 = por %p594_p7, %p593_p6 }
  0xf9   :  { %p596_p9 = pnand %p595_p8, %p589_p5 }
 0x1af   :  { %v396_v48 = vpop.f32.mrf.mxu1 }
 0x1b0   :  { %v397_v49 = vadd.f32 %v456_v47, %v396_v48 }
 0x1b1   :  { %v531_v50 = vpop.f32.mrf.mxu1 }
 0x1b2   :  { %402 = vst [vmem:[#allocation2] sm:$0xff] %v397_v49 }
 0x1b3   :  { %v399_v51 = vpop.f32.mrf.mxu1 }
 0x1b4   :  { %599 = shalt.err (!%p596_p9)
}
 0x1b5   :  { %412 = dma.vmem_to_hbm [thread:$0]  %s410_s15, 128, %s774_s5, [#allocation3]   ;;  %v532_v52 = vpop.f32.mrf.mxu1 }
 0x1b6   :  { %608 = dma.done.wait [#allocation3], 128  }
 0x1b7   :  { %609 = vsyncadd [#allocation3], 4294967168 }
 0x1b8   :  { %610 = dma.done.wait [#allocation5], 128  }
 0x1b9   :  { %611 = vsyncadd [#allocation5], 4294967168 }
 0x1ba   :  { %429 = vsyncpa [#allocation3], 1 }
 0x1bb   :  { %430 = vsyncpa [#allocation5], 1 }

</bundles_post_ra>
